<compile_context>
chip_gen: v7x
topology: tpu7x:2x2x1
jax: 0.10.0
libtpu: 0.0.40
codegen_flags: <defaults>
</compile_context>

<pallas_src>
import functools

import jax
import jax.numpy as jnp
from jax.experimental import pallas as pl
from jax.experimental.pallas import tpu as pltpu


def _head_kernel(res_ref, x_ref, w1_ref, b1_ref, w2_ref, b2_ref, o_ref):
    """One batch-tile of the residual bottleneck head.

    res_ref : SMEM (1,)      scalar residual ratio (f32)
    x_ref   : VMEM (TB, D)   embeddings tile (native dtype: f32 or bf16)
    w1_ref  : VMEM (D, H)    Linear1 weight (transposed vs torch, I/O dtype)
    b1_ref  : VMEM (1, H)    Linear1 bias (f32)
    w2_ref  : VMEM (H, D)    Linear2 weight (transposed vs torch, I/O dtype)
    b2_ref  : VMEM (1, D)    Linear2 bias (f32)
    o_ref   : VMEM (TB, D)   output tile (same dtype as input)
    """
    r = res_ref[0]                 # read scalar once
    one_minus_r = 1.0 - r          # hoisted next to the read

    x = x_ref[...]                 # native dtype feeds the MXU, f32 accumulate

    # Linear1 + ReLU (f32 accumulate / f32 elementwise, biases already f32).
    h = jnp.dot(x, w1_ref[...], preferred_element_type=jnp.float32)
    h = jnp.maximum(h + b1_ref[...], 0.0)

    # Linear2 + ReLU.  Hidden tile cast to the weight dtype so bf16 weights use
    # the native MXU bf16 path; no-op for f32 weights.
    y = jnp.dot(h.astype(w2_ref.dtype), w2_ref[...],
                preferred_element_type=jnp.float32)
    y = jnp.maximum(y + b2_ref[...], 0.0)

    # Residual mix with learnable scalar, computed in f32, stored in I/O dtype.
    o_ref[...] = (r * y + one_minus_r * x.astype(jnp.float32)).astype(o_ref.dtype)


def _round_up(x, m):
    return ((x + m - 1) // m) * m


@functools.partial(jax.jit, static_argnames=("block_batch",))
def residual_learnable_head(embeddings, residual, w1, b1, w2, b2, *,
                            block_batch=1024):
    """Residual bottleneck head.  embeddings: [B, D]; residual: scalar or [1]."""
    B, D = embeddings.shape
    H = w1.shape[1]
    io_dtype = embeddings.dtype

    # Wrapper-side dtype plumbing (keeps all per-step casts out of the kernel).
    w1 = w1.astype(io_dtype)
    w2 = w2.astype(io_dtype)
    b1 = b1.reshape(1, H).astype(jnp.float32)
    b2 = b2.reshape(1, D).astype(jnp.float32)
    residual = jnp.asarray(residual, jnp.float32).reshape(1)

    # Batch tile:
    #  * big (default 1024) to amortize per-step overhead against HBM streaming
    #  * at most round_up(ceil(B/2), 256) so >=2 grid steps exist for v7x megacore
    #  * rounded to the dtype's packed sublane multiple (8 f32 / 16 bf16 / 32 i8)
    #  * never larger than the (rounded-up) batch
    sub = max(8, 32 // jnp.dtype(io_dtype).itemsize)
    tb = min(block_batch, _round_up(pl.cdiv(B, 2), 256))
    tb = _round_up(tb, sub)
    tb = max(sub, min(tb, _round_up(B, sub)))

    # Ragged last block is fine: rows are independent, OOB writes are dropped.
    grid = (pl.cdiv(B, tb),)

    # Raise the scoped VMEM limit only when large tiles actually need it
    # (v5e default scoped limit is 16 MiB; default tb=1024 f32 uses ~2 MiB).
    io_itemsize = jnp.dtype(io_dtype).itemsize
    tile_bytes = tb * D * io_itemsize
    weight_bytes = (w1.size + w2.size) * io_itemsize + (b1.size + b2.size) * 4
    vmem_needed = 2 * 2 * tile_bytes + 2 * weight_bytes + (1 << 20)
    cp_kwargs = dict(dimension_semantics=("parallel",))
    if vmem_needed > (16 << 20):
        cp_kwargs["vmem_limit_bytes"] = int(min(vmem_needed, 128 << 20))

    return pl.pallas_call(
        _head_kernel,
        out_shape=jax.ShapeDtypeStruct((B, D), io_dtype),
        grid_spec=pltpu.PrefetchScalarGridSpec(
            num_scalar_prefetch=0,
            grid=grid,
            in_specs=[
                # scalar residual ratio lives in SMEM, whole-array (no tiling)
                pl.BlockSpec(memory_space=pltpu.MemorySpace.SMEM),
                # embeddings: tiled over batch, streamed
                pl.BlockSpec((tb, D), lambda i: (i, 0)),
                # weights / biases: constant index maps -> resident in VMEM
                pl.BlockSpec((D, H), lambda i: (0, 0)),
                pl.BlockSpec((1, H), lambda i: (0, 0)),
                pl.BlockSpec((H, D), lambda i: (0, 0)),
                pl.BlockSpec((1, D), lambda i: (0, 0)),
            ],
            out_specs=pl.BlockSpec((tb, D), lambda i: (i, 0)),
        ),
        compiler_params=pltpu.CompilerParams(**cp_kwargs),
    )(residual, embeddings, w1, b1, w2, b2)


def _torch_linear_init(key, fan_in, fan_out):
    """Deterministic init mimicking torch.nn.Linear default (uniform +-1/sqrt(fan_in))."""
    kw, kb = jax.random.split(key)
    bound = 1.0 / jnp.sqrt(jnp.float32(fan_in))
    # stored as [in, out] (transposed vs torch's [out, in])
    w = jax.random.uniform(kw, (fan_in, fan_out), jnp.float32, -bound, bound)
    b = jax.random.uniform(kb, (1, fan_out), jnp.float32, -bound, bound)
    return w, b


def _reference(embeddings, residual, w1, b1, w2, b2):
    h = jnp.maximum(embeddings @ w1 + b1, 0.0)
    y = jnp.maximum(h @ w2 + b2, 0.0)
    r = jnp.asarray(residual, jnp.float32).reshape(())
    return r * y + (1.0 - r) * embeddings


if __name__ == "__main__":
    # Module hyper-params (synthetic, deterministic init — no checkpoint load).
    in_dim = 128
    bottleneck_reduction_ratio = 4
    hidden = in_dim // bottleneck_reduction_ratio   # 32
    initial_residual_ratio = 0.5

    key = jax.random.PRNGKey(0)
    k_x, k_x2, k_x3, k_l1, k_l2 = jax.random.split(key, 5)

    w1, b1 = _torch_linear_init(k_l1, in_dim, hidden)
    w2, b2 = _torch_linear_init(k_l2, hidden, in_dim)
    residual = jnp.array([initial_residual_ratio], dtype=jnp.float32)

    # Case 1: small f32 batch.
    batch = 16
    embeddings = jax.random.normal(k_x, (batch, in_dim), jnp.float32)
    out = jax.block_until_ready(
        residual_learnable_head(embeddings, residual, w1, b1, w2, b2))
    ref = _reference(embeddings, residual, w1, b1, w2, b2)
    assert out.shape == (batch, in_dim)
    assert jnp.allclose(out, ref, atol=1e-5, rtol=1e-5), "mismatch vs reference"

    # Case 2: batch not a multiple of the tile / sublane -> ragged last block path.
    batch2 = 20
    embeddings2 = jax.random.normal(k_x2, (batch2, in_dim), jnp.float32)
    out2 = jax.block_until_ready(
        residual_learnable_head(embeddings2, residual, w1, b1, w2, b2))
    ref2 = _reference(embeddings2, residual, w1, b1, w2, b2)
    assert out2.shape == (batch2, in_dim)
    assert jnp.allclose(out2, ref2, atol=1e-5, rtol=1e-5), "mismatch vs reference (ragged)"

    # Case 3: bf16 I/O -> bf16 weights on the MXU, 16-row sublane multiple.
    batch3 = 24
    embeddings3 = jax.random.normal(k_x3, (batch3, in_dim), jnp.float32).astype(jnp.bfloat16)
    out3 = jax.block_until_ready(
        residual_learnable_head(embeddings3, residual, w1, b1, w2, b2))
    ref3 = _reference(embeddings3.astype(jnp.float32), residual, w1, b1, w2, b2)
    assert out3.shape == (batch3, in_dim) and out3.dtype == jnp.bfloat16
    assert jnp.allclose(out3.astype(jnp.float32), ref3, atol=6e-2, rtol=6e-2), \
        "mismatch vs reference (bf16)"

    print("KERNEL_OK")
</pallas_src>

<mosaic_0001>
module attributes {stable_mosaic.version = 11 : i64} {
  func.func @_head_kernel(%arg0: i32, %arg1: memref<1xf32, #tpu.memory_space<smem>>, %arg2: memref<16x128xf32, #tpu.memory_space<vmem>>, %arg3: memref<128x32xf32, #tpu.memory_space<vmem>>, %arg4: memref<1x32xf32, #tpu.memory_space<vmem>>, %arg5: memref<32x128xf32, #tpu.memory_space<vmem>>, %arg6: memref<1x128xf32, #tpu.memory_space<vmem>>, %arg7: memref<16x128xf32, #tpu.memory_space<vmem>>) attributes {dimension_semantics = [#tpu.dimension_semantics<parallel>], iteration_bounds = array<i64: 1>, scalar_prefetch = 0 : i64, scratch_operands = 0 : i64, tpu.core_type = #tpu.core_type<tc>, window_params = [{transform_indices = @transform_0, window_bounds = array<i64: 1>}, {transform_indices = @transform_1, window_bounds = array<i64: 16, 128>}, {pipeline_mode = #tpu.pipeline_mode<synchronous>, transform_indices = @transform_2, window_bounds = array<i64: 128, 32>}, {pipeline_mode = #tpu.pipeline_mode<synchronous>, transform_indices = @transform_3, window_bounds = array<i64: 1, 32>}, {pipeline_mode = #tpu.pipeline_mode<synchronous>, transform_indices = @transform_4, window_bounds = array<i64: 32, 128>}, {pipeline_mode = #tpu.pipeline_mode<synchronous>, transform_indices = @transform_5, window_bounds = array<i64: 1, 128>}, {transform_indices = @transform_6, window_bounds = array<i64: 16, 128>}]} {
    %c0 = arith.constant 0 : index
    %0 = memref.load %arg1[%c0] : memref<1xf32, #tpu.memory_space<smem>>
    %cst = arith.constant 1.000000e+00 : f32
    %1 = arith.subf %cst, %0 : f32
    %c0_0 = arith.constant 0 : index
    %c0_1 = arith.constant 0 : index
    %2 = vector.load %arg2[%c0_0, %c0_1] : memref<16x128xf32, #tpu.memory_space<vmem>>, vector<16x128xf32>
    %c0_2 = arith.constant 0 : index
    %c0_3 = arith.constant 0 : index
    %3 = vector.load %arg3[%c0_2, %c0_3] : memref<128x32xf32, #tpu.memory_space<vmem>>, vector<128x32xf32>
    %cst_4 = arith.constant dense<0.000000e+00> : vector<16x32xf32>
    %4 = tpu.matmul %2, %3, %cst_4 {dimension_numbers = #tpu.dot_dimension_numbers<[1], [0], [0], [1], [0, 0, 1, 1], [], []>} : vector<16x128xf32>, vector<128x32xf32>, vector<16x32xf32> -> vector<16x32xf32>
    %c0_5 = arith.constant 0 : index
    %c0_6 = arith.constant 0 : index
    %5 = vector.load %arg4[%c0_5, %c0_6] : memref<1x32xf32, #tpu.memory_space<vmem>>, vector<1x32xf32>
    %6 = vector.broadcast %5 : vector<1x32xf32> to vector<16x32xf32>
    %7 = arith.addf %4, %6 : vector<16x32xf32>
    %cst_7 = arith.constant 0.000000e+00 : f32
    %8 = vector.broadcast %cst_7 : f32 to vector<16x32xf32>
    %9 = arith.maximumf %7, %8 : vector<16x32xf32>
    %c0_8 = arith.constant 0 : index
    %c0_9 = arith.constant 0 : index
    %10 = vector.load %arg5[%c0_8, %c0_9] : memref<32x128xf32, #tpu.memory_space<vmem>>, vector<32x128xf32>
    %cst_10 = arith.constant dense<0.000000e+00> : vector<16x128xf32>
    %11 = tpu.matmul %9, %10, %cst_10 {dimension_numbers = #tpu.dot_dimension_numbers<[1], [0], [0], [1], [0, 0, 1, 1], [], []>} : vector<16x32xf32>, vector<32x128xf32>, vector<16x128xf32> -> vector<16x128xf32>
    %c0_11 = arith.constant 0 : index
    %c0_12 = arith.constant 0 : index
    %12 = vector.load %arg6[%c0_11, %c0_12] : memref<1x128xf32, #tpu.memory_space<vmem>>, vector<1x128xf32>
    %13 = vector.broadcast %12 : vector<1x128xf32> to vector<16x128xf32>
    %14 = arith.addf %11, %13 : vector<16x128xf32>
    %cst_13 = arith.constant 0.000000e+00 : f32
    %15 = vector.broadcast %cst_13 : f32 to vector<16x128xf32>
    %16 = arith.maximumf %14, %15 : vector<16x128xf32>
    %17 = vector.broadcast %0 : f32 to vector<16x128xf32>
    %18 = arith.mulf %17, %16 : vector<16x128xf32>
    %19 = vector.broadcast %1 : f32 to vector<16x128xf32>
    %20 = arith.mulf %19, %2 : vector<16x128xf32>
    %21 = arith.addf %18, %20 : vector<16x128xf32>
    %c0_14 = arith.constant 0 : index
    %c0_15 = arith.constant 0 : index
    %22 = vector.load %arg7[%c0_14, %c0_15] : memref<16x128xf32, #tpu.memory_space<vmem>>, vector<16x128xf32>
    tpu.vector_store %arg7[%c0_14, %c0_15], %21 {strides = array<i32>} : memref<16x128xf32, #tpu.memory_space<vmem>>, vector<16x128xf32>,
    return
  }
  func.func @transform_0(%arg0: i32) -> i32 {
    %c0_i32 = arith.constant 0 : i32
    %c0_i32_0 = arith.constant 0 : i32
    return %c0_i32 : i32
  }
  func.func @transform_1(%arg0: i32) -> (i32, i32) {
    %c0_i32 = arith.constant 0 : i32
    %c0_i32_0 = arith.constant 0 : i32
    return %arg0, %c0_i32 : i32, i32
  }
  func.func @transform_2(%arg0: i32) -> (i32, i32) {
    %c0_i32 = arith.constant 0 : i32
    %c0_i32_0 = arith.constant 0 : i32
    %c0_i32_1 = arith.constant 0 : i32
    return %c0_i32, %c0_i32_0 : i32, i32
  }
  func.func @transform_3(%arg0: i32) -> (i32, i32) {
    %c0_i32 = arith.constant 0 : i32
    %c0_i32_0 = arith.constant 0 : i32
    %c0_i32_1 = arith.constant 0 : i32
    return %c0_i32, %c0_i32_0 : i32, i32
  }
  func.func @transform_4(%arg0: i32) -> (i32, i32) {
    %c0_i32 = arith.constant 0 : i32
    %c0_i32_0 = arith.constant 0 : i32
    %c0_i32_1 = arith.constant 0 : i32
    return %c0_i32, %c0_i32_0 : i32, i32
  }
  func.func @transform_5(%arg0: i32) -> (i32, i32) {
    %c0_i32 = arith.constant 0 : i32
    %c0_i32_0 = arith.constant 0 : i32
    %c0_i32_1 = arith.constant 0 : i32
    return %c0_i32, %c0_i32_0 : i32, i32
  }
  func.func @transform_6(%arg0: i32) -> (i32, i32) {
    %c0_i32 = arith.constant 0 : i32
    %c0_i32_0 = arith.constant 0 : i32
    return %arg0, %c0_i32 : i32, i32
  }
}

</mosaic_0001>

<bundles_post_ra>
// kernel: residual_learnable_head.1
= control target key start
LH: loop header
LB: loop body
LE: loop exit
PB: predicated region body
PF: predicated region fallthrough
CT: control target
= control target key end

     0   :  { %s519_s0 = inlined_call_operand.<no memory space> [shape: f32[1], index: 0, kind: input, shape index: {}]   ;;  %s520_s1 = inlined_call_operand.vmem [shape: f32[16,128], index: 1, kind: input, shape index: {}]   ;;  %s521_s2 = inlined_call_operand.vmem [shape: f32[128,32], index: 2, kind: input, shape index: {}]   ;;  %s522_s3 = inlined_call_operand.vmem [shape: f32[1,32], index: 3, kind: input, shape index: {}]   ;;  %s523_s4 = inlined_call_operand.vmem [shape: f32[32,128], index: 4, kind: input, shape index: {}]   ;;  %s524_s5 = inlined_call_operand.vmem [shape: f32[1,128], index: 5, kind: input, shape index: {}]   ;;  %s525_s6 = inlined_call_operand.hbm [shape: f32[16,128], index: 6, kind: output, shape index: {}]  }
   0x1   :  { %v29_v0 = vld [vmem:[%s521_s2] sm:$0xff]  ;;  %v30_v1 = vld [vmem:[%s521_s2 + $0x8] sm:$0xff]  ;;  %v31_v2 = vld [vmem:[%s521_s2 + $0x10] sm:$0xff] }
   0x2   :  { %v324_v3 = vpack.c.bf16 %v30_v1, %v29_v0  ;;  %v32_v4 = vld [vmem:[%s521_s2 + $0x18] sm:$0xff]  ;;  %v33_v6 = vld [vmem:[%s521_s2 + $0x20] sm:$0xff]  ;;  %v34_v7 = vld [vmem:[%s521_s2 + $0x28] sm:$0xff] }
   0x3   :  { %v328_v5 = vpack.c.bf16 %v32_v4, %v31_v2  ;;  %v332_v8 = vpack.c.bf16 %v34_v7, %v33_v6  ;;  %v35_v9 = vld [vmem:[%s521_s2 + $0x30] sm:$0xff]  ;;  %v36_v10 = vld [vmem:[%s521_s2 + $0x38] sm:$0xff]  ;;  %v27_v11 = vld [vmem:[%s520_s1] sm:$0xff] }
   0x4   :  { %325 = vmatprep.subr.bf16.mxu0 %v324_v3  ;;  %310 = vmatprep.mubr.f32.mxu0 %v27_v11  ;;  %v129_v12 = vld [vmem:[%s523_s4] sm:$0xff]  ;;  %v130_v13 = vld [vmem:[%s523_s4 + $0x8] sm:$0xff] }
   0x5   :  { %327 = vmatpush3.bf16.msra.mxu0 %v324_v3 }
   0x6   :  { %329 = vmatprep.subr.bf16.mxu0 %v328_v5 }
   0x7   :  { %12 = vsyncpa [#allocation4], 0  ;;  %v356_v14 = vpack.c.bf16 %v130_v13, %v129_v12  ;;  %v336_v15 = vpack.c.bf16 %v36_v10, %v35_v9  ;;  %v37_v16 = vld [vmem:[%s521_s2 + $0x40] sm:$0xff]  ;;  %v38_v17 = vld [vmem:[%s521_s2 + $0x48] sm:$0xff]  ;;  %vm140_vm0 = vcmask 261120   ;;  %v224_v44 = vstv %s519_s0  ;;  %s391_s22 = smov [#allocation3]  }
   0x8   :  { %v340_v18 = vpack.c.bf16 %v38_v17, %v37_v16  ;;  %v39_v19 = vld [vmem:[%s521_s2 + $0x50] sm:$0xff]  ;;  %v40_v20 = vld [vmem:[%s521_s2 + $0x58] sm:$0xff]  ;;  %v41_v22 = vld [vmem:[%s521_s2 + $0x60] sm:$0xff]  ;;  %s239_s23 = sshll.u32 %s391_s22, 4  ;;  %s240_s23 = int_to_ptr.vmem [resolvable:$true] %s239_s23 }
   0x9   :  { %331 = vmatpush3.bf16.msra.mxu0 %v328_v5  ;;  %357 = vmatprep.subr.bf16.mxu1 %v356_v14  ;;  %v344_v21 = vpack.c.bf16 %v40_v20, %v39_v19  ;;  %v42_v23 = vld [vmem:[%s521_s2 + $0x68] sm:$0xff]  ;;  %v43_v25 = vld [vmem:[%s521_s2 + $0x70] sm:$0xff]  ;;  %v44_v26 = vld [vmem:[%s521_s2 + $0x78] sm:$0xff]  ;;  %p372_p1 = scmp.lt.s32.totalorder %s240_s23, %s240_s23 }
   0xa   :  { %333 = vmatprep.subr.bf16.mxu0 %v332_v8  ;;  %359 = vmatpush3.bf16.msra.mxu1 %v356_v14  ;;  %v348_v24 = vpack.c.bf16 %v42_v23, %v41_v22  ;;  %v352_v27 = vpack.c.bf16 %v44_v26, %v43_v25  ;;  %v28_v28 = vld [vmem:[%s520_s1 + $0x8] sm:$0xff]  ;;  %v131_v29 = vld [vmem:[%s523_s4 + $0x10] sm:$0xff]  ;;  %v132_v30 = vld [vmem:[%s523_s4 + $0x18] sm:$0xff]  ;;  %s26_s4 = ssub.f32 1.0, %s519_s0 }
   0xb   :  { %v360_v31 = vpack.c.bf16 %v132_v30, %v131_v29  ;;  %v250_v32 = vld [vmem:[%s522_s3] ss:$0 sm:$0xff] }
   0xc   :  { %v251_v39 = vld [vmem:[%s524_s5] ss:$0 sm:$0xff]  ;;  %v227_v40 = vstv %s26_s4  ;;  %s367_s5 = scalar_lea.vmem %s240_s23, 256 }
   0xd   :  { %335 = vmatpush3.bf16.msra.mxu0 %v332_v8  ;;  %361 = vmatprep.subr.bf16.mxu1 %v360_v31  ;;  %v229_v46 = vmul.f32 %v227_v40, %v28_v28  ;;  %v228_v48 = vmul.f32 %v227_v40, %v27_v11  ;;  %p368_p0 = scmp.ne.s32.totalorder %s240_s23, %s367_s5  ;;  %p373_p2 = scmp.lt.s32.totalorder %s367_s5, %s367_s5 }
   0xe   :  { %337 = vmatprep.subr.bf16.mxu0 %v336_v15  ;;  %363 = vmatpush3.bf16.msra.mxu1 %v360_v31 }
   0xf   :  { %p374_p3 = por %p373_p2, %p372_p1 }
  0x11   :  { %339 = vmatpush3.bf16.msra.mxu0 %v336_v15  ;;  %p375_p4 = pnand %p374_p3, %p368_p0 }
  0x12   :  { %341 = vmatprep.subr.bf16.mxu0 %v340_v18 }
  0x15   :  { %343 = vmatpush3.bf16.msra.mxu0 %v340_v18 }
  0x16   :  { %345 = vmatprep.subr.bf16.mxu0 %v344_v21 }
  0x19   :  { %347 = vmatpush3.bf16.msra.mxu0 %v344_v21 }
  0x1a   :  { %349 = vmatprep.subr.bf16.mxu0 %v348_v24 }
  0x1d   :  { %351 = vmatpush3.bf16.msra.mxu0 %v348_v24 }
  0x1e   :  { %353 = vmatprep.subr.bf16.mxu0 %v352_v27 }
  0x21   :  { %355 = vmatpush3.bf16.msra.mxu0 %v352_v27 }
  0x24   :  { %311 = vmatmul.mubr.f32.vlgmr.msra.gmra.mrb[0].mxu0 %v28_v28 }
  0xf7   :  { %v312_v33 = vpop.f32.mrb[0].mxu0 }
  0xf8   :  { %v124_v34 = vadd.f32 %v312_v33, %v250_v32  ;;  %v118_v35 = vpop.f32.mrb[1].mxu0 }
  0xf9   :  { %v119_v36 = vadd.f32 %v250_v32, %v118_v35 }
  0xfa   :  { %v128_v38 = vmax.f32 %v124_v34, 0.0 }
  0xfb   :  { %v127_v37 = vmax.f32 %v119_v36, 0.0 }
  0xfd   :  { %321 = vmatprep.mubr.msk.f32.mxu1 %vm140_vm0, %v127_v37 }
  0xfe   :  { %322 = vmatmul.mubr.msk.f32.vlgmr.msra.gmra.mrb[0].mxu1 %vm140_vm0, %v128_v38 }
 0x1d1   :  { %v323_v41 = vpop.f32.mrb[0].mxu1 }
 0x1d2   :  { %v219_v42 = vadd.f32 %v323_v41, %v251_v39  ;;  %v213_v43 = vpop.f32.mrb[1].mxu1 }
 0x1d3   :  { %v214_v45 = vadd.f32 %v251_v39, %v213_v43 }
 0x1d4   :  { %v223_v47 = vmax.f32 %v219_v42, 0.0 }
 0x1d5   :  { %v222_v49 = vmax.f32 %v214_v45, 0.0 }
 0x1d6   :  { %v226_v50 = vmul.f32 %v224_v44, %v223_v47 }
 0x1d7   :  { %v225_v51 = vmul.f32 %v224_v44, %v222_v49 }
 0x1d8   :  { %v231_v52 = vadd.f32 %v229_v46, %v226_v50 }
 0x1d9   :  { %v230_v53 = vadd.f32 %v228_v48, %v225_v51 }
 0x1da   :  { %233 = vst [vmem:[#allocation3 + $0x8] sm:$0xff] %v231_v52 }
 0x1db   :  { %232 = vst [vmem:[#allocation3] sm:$0xff] %v230_v53 }
 0x1dc   :  { %378 = shalt.err (!%p375_p4)
}
 0x1dd   :  { %s379_s25 = scalar_lea.hbm %s525_s6, 256 }
 0x1de   :  { %p380_p5 = scmp.ne.s32.totalorder %s525_s6, %s379_s25  ;;  %p383_p6 = scmp.lt.u32.totalorder %s379_s25, %s525_s6 }
 0x1e0   :  { %p385_p7 = pnand %p383_p6, %p380_p5 }
 0x1e2   :  { %388 = shalt.err (!%p385_p7)
}
 0x1e3   :  { %s392_s30 = smov 128   ;;  %s393_s7 = smov 8  }
 0x1e4   :  { %245 = dma.vmem_to_hbm [thread:$0]  %s240_s23, 256, %s525_s6, [#allocation4], %s392_s30, %s392_s30, %s393_s7  }
 0x1e5   :  { %389 = dma.done.wait [#allocation4], 256  }
 0x1e6   :  { %390 = vsyncadd [#allocation4], 4294967040 }
 0x1e7   :  { %249 = vsyncpa [#allocation4], 1 }

</bundles_post_ra>
